<compile_context>
chip_gen: v7x
topology: tpu7x:2x2x1
jax: 0.10.0
libtpu: 0.0.40
codegen_flags: <defaults>
</compile_context>

<pallas_src>
import jax
import jax.numpy as jnp
from jax.experimental import pallas as pl
from jax.experimental.pallas import tpu as pltpu

LANES = 128
SUBLANES = 8
# ~4 MiB blocks: >=85% of HBM roofline per measured elementwise data, and the
# double-buffered working set stays well inside v7x's 64 MiB VMEM.
_TARGET_BLOCK_BYTES = 4 * 1024 * 1024
# Above v5e's 16 MiB default scoped VMEM, below v7x's 64 MiB physical VMEM.
_VMEM_LIMIT_BYTES = 32 * 1024 * 1024
# Wide lane-dense last-dim candidates (largest that still fills >= one (8, C) tile wins).
_WIDTH_CANDIDATES = (256, 512, 1024, 2048, 4096, 8192, 16384, 32768)


def _swish_kernel(beta_ref, x_ref, o_ref):
    # beta_ref: (1,) f32 scalar in SMEM; x_ref / o_ref: (block_rows, C) VMEM tiles.
    beta = beta_ref[0]
    x = x_ref[...].astype(jnp.float32)           # explicit f32 compute path
    y = x * jax.nn.sigmoid(beta * x)             # sigmoid runs on the EUP slot (free; HBM-bound)
    o_ref[...] = y.astype(o_ref.dtype)           # explicit cast back on store


def _cdiv(a: int, b: int) -> int:
    return -(-a // b)


def swish(x: jax.Array, beta) -> jax.Array:
    """Elementwise Swish with learnable scalar beta, computed in a Pallas kernel."""
    orig_shape = x.shape
    dtype = x.dtype
    n = x.size
    itemsize = x.dtype.itemsize

    # 1) Widest lane-dense width C that still gives >= one full (8, C) tile of real data.
    C = LANES
    for cand in _WIDTH_CANDIDATES:
        if n >= SUBLANES * cand:
            C = cand

    # 2) Rows of real data, rounded up to a sublane multiple.
    rows_data = _cdiv(_cdiv(n, C), SUBLANES) * SUBLANES

    # 3) Block rows: target ~_TARGET_BLOCK_BYTES per block, multiple of 8.
    br = min(rows_data, _TARGET_BLOCK_BYTES // (C * itemsize))
    block_rows = max(SUBLANES, (br // SUBLANES) * SUBLANES)

    # 4) Round total rows so every block is full (no partial/masked blocks).
    rows = _cdiv(rows_data, block_rows) * block_rows
    padded_n = rows * C

    flat = x.reshape(-1)
    if padded_n != n:
        # Trace-time fallback for ragged sizes only; common NCHW activation
        # shapes skip this extra HBM pass entirely.
        flat = jnp.pad(flat, (0, padded_n - n))
    x2d = flat.reshape(rows, C)

    grid = (rows // block_rows,)
    beta_smem = jnp.asarray(beta, dtype=jnp.float32).reshape(1)

    out2d = pl.pallas_call(
        _swish_kernel,
        out_shape=jax.ShapeDtypeStruct((rows, C), dtype),
        grid=grid,
        in_specs=[
            pl.BlockSpec(memory_space=pltpu.SMEM),            # beta scalar (whole array, SMEM)
            pl.BlockSpec((block_rows, C), lambda i: (i, 0)),  # x block
        ],
        out_specs=pl.BlockSpec((block_rows, C), lambda i: (i, 0)),
        compiler_params=pltpu.CompilerParams(
            dimension_semantics=("parallel",),   # shardable across v7x's 2 TensorCores
            vmem_limit_bytes=_VMEM_LIMIT_BYTES,
        ),
    )(beta_smem, x2d)

    if padded_n != n:
        return out2d.reshape(-1)[:n].reshape(orig_shape)
    return out2d.reshape(orig_shape)


if __name__ == "__main__":
    key = jax.random.PRNGKey(0)
    # NCHW input, matching the PyTorch convention.
    x = jax.random.normal(key, (2, 4, 16, 16), dtype=jnp.float32)
    # Deterministic parameter init, matching nn.Parameter(torch.tensor(1.0)).
    beta = jnp.float32(1.0)

    out = jax.block_until_ready(swish(x, beta))

    # Correctness check against plain-JAX reference.
    ref = x * jax.nn.sigmoid(beta * x)
    assert out.shape == x.shape and out.dtype == x.dtype
    assert jnp.allclose(out, ref, atol=1e-6, rtol=1e-6)

    # Exercise the ragged-size pad/slice fallback path once as well.
    x2 = jax.random.normal(jax.random.PRNGKey(1), (3, 5, 7), dtype=jnp.float32)
    out2 = jax.block_until_ready(swish(x2, beta))
    ref2 = x2 * jax.nn.sigmoid(beta * x2)
    assert out2.shape == x2.shape and out2.dtype == x2.dtype
    assert jnp.allclose(out2, ref2, atol=1e-6, rtol=1e-6)

    print("KERNEL_OK")
</pallas_src>

<mosaic_0001>
module attributes {stable_mosaic.version = 11 : i64} {
  func.func @_swish_kernel(%arg0: i32, %arg1: memref<1xf32, #tpu.memory_space<smem>>, %arg2: memref<8x256xf32, #tpu.memory_space<vmem>>, %arg3: memref<8x256xf32, #tpu.memory_space<vmem>>) attributes {dimension_semantics = [#tpu.dimension_semantics<parallel>], iteration_bounds = array<i64: 1>, scalar_prefetch = 0 : i64, scratch_operands = 0 : i64, tpu.core_type = #tpu.core_type<tc>, window_params = [{transform_indices = @transform_0, window_bounds = array<i64: 1>}, {transform_indices = @transform_1, window_bounds = array<i64: 8, 256>}, {transform_indices = @transform_2, window_bounds = array<i64: 8, 256>}]} {
    %c0 = arith.constant 0 : index
    %0 = memref.load %arg1[%c0] : memref<1xf32, #tpu.memory_space<smem>>
    %c0_0 = arith.constant 0 : index
    %c0_1 = arith.constant 0 : index
    %1 = vector.load %arg2[%c0_0, %c0_1] : memref<8x256xf32, #tpu.memory_space<vmem>>, vector<8x256xf32>
    %2 = vector.broadcast %0 : f32 to vector<8x256xf32>
    %3 = arith.mulf %2, %1 : vector<8x256xf32>
    %4 = arith.negf %3 : vector<8x256xf32>
    %5 = math.exp %4 : vector<8x256xf32>
    %cst = arith.constant 1.000000e+00 : f32
    %6 = vector.broadcast %cst : f32 to vector<8x256xf32>
    %7 = arith.addf %6, %5 : vector<8x256xf32>
    %8 = arith.divf %6, %7 : vector<8x256xf32>
    %9 = arith.mulf %1, %8 : vector<8x256xf32>
    %c0_2 = arith.constant 0 : index
    %c0_3 = arith.constant 0 : index
    %10 = vector.load %arg3[%c0_2, %c0_3] : memref<8x256xf32, #tpu.memory_space<vmem>>, vector<8x256xf32>
    tpu.vector_store %arg3[%c0_2, %c0_3], %9 {strides = array<i32>} : memref<8x256xf32, #tpu.memory_space<vmem>>, vector<8x256xf32>,
    return
  }
  func.func @transform_0(%arg0: i32) -> i32 {
    %c0_i32 = arith.constant 0 : i32
    %c0_i32_0 = arith.constant 0 : i32
    return %c0_i32 : i32
  }
  func.func @transform_1(%arg0: i32) -> (i32, i32) {
    %c0_i32 = arith.constant 0 : i32
    %c0_i32_0 = arith.constant 0 : i32
    return %arg0, %c0_i32 : i32, i32
  }
  func.func @transform_2(%arg0: i32) -> (i32, i32) {
    %c0_i32 = arith.constant 0 : i32
    %c0_i32_0 = arith.constant 0 : i32
    return %arg0, %c0_i32 : i32, i32
  }
}

</mosaic_0001>

<bundles_post_ra>
// kernel: tpu_custom_call.1
= control target key start
LH: loop header
LB: loop body
LE: loop exit
PB: predicated region body
PF: predicated region fallthrough
CT: control target
= control target key end

     0   :  { %8 = vsyncpa [#allocation4], 0  ;;  %s166_s0 = inlined_call_operand.<no memory space> [shape: f32[1], index: 0, kind: input, shape index: {}]   ;;  %s167_s1 = inlined_call_operand.hbm [shape: f32[8,256], index: 1, kind: input, shape index: {}]   ;;  %s168_s2 = inlined_call_operand.hbm [shape: f32[8,256], index: 2, kind: output, shape index: {}]  }
   0x1   :  { %9 = vsyncpa [#allocation5], 0  ;;  %s122_s9 = smov [#allocation3]   ;;  %s74_s13 = scalar_lea.hbm %s167_s1, 256 }
   0x2   :  { %s18_s10 = sshll.u32 %s122_s9, 4  ;;  %p75_p0 = scmp.ne.s32.totalorder %s167_s1, %s74_s13  ;;  %s19_s10 = int_to_ptr.vmem [resolvable:$true] %s18_s10 }
   0x3   :  { %p78_p1 = scmp.lt.u32.totalorder %s74_s13, %s167_s1 }
   0x5   :  { %p80_p2 = pnand %p78_p1, %p75_p0 }
   0x7   :  { %83 = shalt.err (!%p80_p2)
}
   0x8   :  { %s84_s18 = scalar_lea.vmem %s19_s10, 256  ;;  %p89_p4 = scmp.lt.s32.totalorder %s19_s10, %s19_s10 }
   0x9   :  { %p85_p3 = scmp.ne.s32.totalorder %s19_s10, %s84_s18  ;;  %p90_p5 = scmp.lt.s32.totalorder %s84_s18, %s84_s18 }
   0xb   :  { %p91_p6 = por %p90_p5, %p89_p4 }
   0xd   :  { %p92_p7 = pnand %p91_p6, %p85_p3 }
   0xf   :  { %95 = shalt.err (!%p92_p7)
}
  0x10   :  { %21 = dma.hbm_to_vmem [thread:$0]  %s167_s1, 256, %s19_s10, [#allocation4]  }
  0x11   :  { %118 = dma.done.wait [#allocation4], 256  }
  0x12   :  { %119 = vsyncadd [#allocation4], 4294967040  ;;  %v28_v0 = vstv %s166_s0  ;;  %v26_v1 = vld [vmem:[#allocation3] sm:$0xff]  ;;  %v27_v2 = vld [vmem:[#allocation3 + $0x8] sm:$0xff]  ;;  %s123_s1 = smov [#allocation6]  }
  0x13   :  { %v29_v3 = vmul.f32 %v28_v0, %v26_v1  ;;  %v30_v4 = vmul.f32 %v28_v0, %v27_v2  ;;  %s53_s23 = sshll.u32 %s123_s1, 4  ;;  %s54_s23 = int_to_ptr.vmem [resolvable:$true] %s53_s23 }
  0x14   :  { %s96_s0 = scalar_lea.vmem %s54_s23, 256  ;;  %p101_p9 = scmp.lt.s32.totalorder %s54_s23, %s54_s23 }
  0x15   :  { %v62_v5 = vmul.f32 -1.442695, %v29_v3  ;;  %v63_v6 = vmul.f32 -1.442695, %v30_v4  ;;  %p97_p8 = scmp.ne.s32.totalorder %s54_s23, %s96_s0  ;;  %p102_p10 = scmp.lt.s32.totalorder %s96_s0, %s96_s0 }
  0x17   :  { %66 = vpow2.f32 %v62_v5  ;;  %p103_p11 = por %p102_p10, %p101_p9 }
  0x18   :  { %68 = vpow2.f32 %v63_v6 }
  0x19   :  { %p104_p12 = pnand %p103_p11, %p97_p8 }
  0x21   :  { %v67_v7 = vpop.eup %66 }
  0x22   :  { %v69_v8 = vpop.eup %68  ;;  %v37_v9 = vadd.f32 1.0, %v67_v7 }
  0x23   :  { %v38_v10 = vadd.f32 1.0, %v69_v8 }
  0x24   :  { %70 = vrcp.f32 %v37_v9 }
  0x25   :  { %72 = vrcp.f32 %v38_v10 }
  0x2e   :  { %v71_v11 = vpop.eup %70 }
  0x2f   :  { %v73_v12 = vpop.eup %72  ;;  %v43_v13 = vmul.f32 %v71_v11, %v26_v1 }
  0x30   :  { %v44_v14 = vmul.f32 %v73_v12, %v27_v2 }
  0x31   :  { %45 = vst [vmem:[#allocation6] sm:$0xff] %v43_v13 }
  0x32   :  { %46 = vst [vmem:[#allocation6 + $0x8] sm:$0xff] %v44_v14 }
  0x33   :  { %107 = shalt.err (!%p104_p12)
}
  0x34   :  { %s108_s26 = scalar_lea.hbm %s168_s2, 256 }
  0x35   :  { %p109_p13 = scmp.ne.s32.totalorder %s168_s2, %s108_s26  ;;  %p112_p0 = scmp.lt.u32.totalorder %s108_s26, %s168_s2 }
  0x37   :  { %p114_p1 = pnand %p112_p0, %p109_p13 }
  0x39   :  { %117 = shalt.err (!%p114_p1)
}
  0x3a   :  { %56 = dma.vmem_to_hbm [thread:$0]  %s54_s23, 256, %s168_s2, [#allocation5]  }
  0x3b   :  { %120 = dma.done.wait [#allocation5], 256  }
  0x3c   :  { %121 = vsyncadd [#allocation5], 4294967040 }
  0x3d   :  { %60 = vsyncpa [#allocation4], 1 }
  0x3e   :  { %61 = vsyncpa [#allocation5], 1 }

</bundles_post_ra>
